<compile_context>
chip_gen: v5e
topology: v5e:2x2
jax: 0.10.0
libtpu: 0.0.40
codegen_flags: <defaults>
</compile_context>

<pallas_src>
import jax
import jax.numpy as jnp
from jax.experimental import pallas as pl
from jax.experimental.pallas import tpu as pltpu


def _group_norm_kernel(x_ref, o_ref):
    # x_ref block: (R, group_size) — R (batch, group) slabs; stats are per row.
    x = x_ref[...].astype(jnp.float32)
    mean = jnp.mean(x, axis=-1, keepdims=True)
    xm = x - mean
    var = jnp.mean(xm * xm, axis=-1, keepdims=True)  # unbiased=False (population)
    # NOTE: reference forward divides by std with NO eps; rsqrt*mul keeps the
    # transcendental on the EUP slot and avoids a vector divide.
    o_ref[...] = (xm * jax.lax.rsqrt(var)).astype(o_ref.dtype)


def _pick_block_rows(rows: int, group_size: int, itemsize: int) -> int:
    """Rows per block: sublane-dense, ~2 MiB DMA tiles, capped at `rows`."""
    target_bytes = 2 << 20  # ~2 MiB/block -> in+out double-buffered <= ~8 MiB
    sublane = 8 if itemsize >= 4 else 16
    row_bytes = max(1, group_size * itemsize)
    max_rows = max(1, target_bytes // row_bytes)
    if max_rows >= rows:
        # Whole row-extent fits the budget: one big lane/sublane-dense block.
        return rows
    r = max(sublane, (max_rows // sublane) * sublane)
    return min(r, rows)


def group_norm(x: jax.Array, num_groups: int, eps: float = 1e-5) -> jax.Array:
    """GroupNorm forward matching the PyTorch module semantics.

    Args:
        x: [batch, channels, height, width] (NCHW).
        num_groups: number of groups; channels must be divisible by it.
        eps: kept for API parity; unused in the forward (as in the reference).
    """
    del eps  # reference forward never applies eps
    batch, channels, height, width = x.shape
    assert channels % num_groups == 0
    rows = batch * num_groups
    group_size = (channels // num_groups) * height * width

    xr = x.reshape(rows, group_size)
    itemsize = xr.dtype.itemsize
    block_rows = _pick_block_rows(rows, group_size, itemsize)
    grid = (pl.cdiv(rows, block_rows),)  # partial last block handled by Pallas

    total = rows * group_size
    cost = pl.CostEstimate(
        flops=6 * total,            # sub, 2x mul (var), mul (scale), mean adds
        transcendentals=rows,       # one rsqrt per (batch, group) slab
        bytes_accessed=2 * total * itemsize,   # read N + write N
    )

    out = pl.pallas_call(
        _group_norm_kernel,
        out_shape=jax.ShapeDtypeStruct((rows, group_size), x.dtype),
        grid=grid,
        in_specs=[pl.BlockSpec((block_rows, group_size), lambda i: (i, 0))],
        out_specs=pl.BlockSpec((block_rows, group_size), lambda i: (i, 0)),
        compiler_params=pltpu.CompilerParams(
            dimension_semantics=("parallel",),
        ),
        cost_estimate=cost,
    )(xr)

    return out.reshape(batch, channels, height, width)


def _group_norm_ref(x, num_groups):
    b, c, h, w = x.shape
    xr = x.reshape(b, num_groups, -1).astype(jnp.float32)
    mean = jnp.mean(xr, axis=-1, keepdims=True)
    var = jnp.mean((xr - mean) ** 2, axis=-1, keepdims=True)
    out = (xr - mean) / jnp.sqrt(var)
    return out.reshape(b, c, h, w).astype(x.dtype)


if __name__ == "__main__":
    key = jax.random.PRNGKey(0)
    batch, channels, height, width = 2, 4, 16, 16
    num_groups = 2

    x = jax.random.normal(key, (batch, channels, height, width), dtype=jnp.float32)

    out = group_norm(x, num_groups)
    out = jax.block_until_ready(out)

    ref = _group_norm_ref(x, num_groups)
    assert out.shape == (batch, channels, height, width)
    assert jnp.allclose(out, ref, atol=1e-5, rtol=1e-5)

    print("KERNEL_OK")
</pallas_src>

<mosaic_0001>
module attributes {stable_mosaic.version = 11 : i64} {
  func.func @_group_norm_kernel(%arg0: i32, %arg1: memref<4x512xf32, #tpu.memory_space<vmem>>, %arg2: memref<4x512xf32, #tpu.memory_space<vmem>>) attributes {dimension_semantics = [#tpu.dimension_semantics<parallel>], iteration_bounds = array<i64: 1>, scalar_prefetch = 0 : i64, scratch_operands = 0 : i64, tpu.core_type = #tpu.core_type<tc>, window_params = [{transform_indices = @transform_0, window_bounds = array<i64: 4, 512>}, {transform_indices = @transform_1, window_bounds = array<i64: 4, 512>}]} {
    %c0 = arith.constant 0 : index
    %c0_0 = arith.constant 0 : index
    %0 = vector.load %arg1[%c0, %c0_0] : memref<4x512xf32, #tpu.memory_space<vmem>>, vector<4x512xf32>
    %cst = arith.constant dense<0.000000e+00> : vector<4xf32>
    %1 = vector.multi_reduction <add>, %0, %cst [1] : vector<4x512xf32> to vector<4xf32>
    %2 = vector.shape_cast %1 : vector<4xf32> to vector<4x1xf32>
    %cst_1 = arith.constant 5.120000e+02 : f32
    %3 = vector.broadcast %cst_1 : f32 to vector<4x1xf32>
    %4 = arith.divf %2, %3 : vector<4x1xf32>
    %5 = vector.broadcast %4 : vector<4x1xf32> to vector<4x512xf32>
    %6 = arith.subf %0, %5 : vector<4x512xf32>
    %7 = arith.mulf %6, %6 : vector<4x512xf32>
    %cst_2 = arith.constant dense<0.000000e+00> : vector<4xf32>
    %8 = vector.multi_reduction <add>, %7, %cst_2 [1] : vector<4x512xf32> to vector<4xf32>
    %9 = vector.shape_cast %8 : vector<4xf32> to vector<4x1xf32>
    %cst_3 = arith.constant 5.120000e+02 : f32
    %10 = vector.broadcast %cst_3 : f32 to vector<4x1xf32>
    %11 = arith.divf %9, %10 : vector<4x1xf32>
    %12 = math.rsqrt %11 : vector<4x1xf32>
    %13 = vector.broadcast %12 : vector<4x1xf32> to vector<4x512xf32>
    %14 = arith.mulf %6, %13 : vector<4x512xf32>
    %c0_4 = arith.constant 0 : index
    %c0_5 = arith.constant 0 : index
    %15 = vector.load %arg2[%c0_4, %c0_5] : memref<4x512xf32, #tpu.memory_space<vmem>>, vector<4x512xf32>
    tpu.vector_store %arg2[%c0_4, %c0_5], %14 {strides = array<i32>} : memref<4x512xf32, #tpu.memory_space<vmem>>, vector<4x512xf32>,
    return
  }
  func.func @transform_0(%arg0: i32) -> (i32, i32) {
    %c0_i32 = arith.constant 0 : i32
    %c0_i32_0 = arith.constant 0 : i32
    return %arg0, %c0_i32 : i32, i32
  }
  func.func @transform_1(%arg0: i32) -> (i32, i32) {
    %c0_i32 = arith.constant 0 : i32
    %c0_i32_0 = arith.constant 0 : i32
    return %arg0, %c0_i32 : i32, i32
  }
}

</mosaic_0001>

<bundles_post_ra>
// kernel: tpu_custom_call.1
= control target key start
LH: loop header
LB: loop body
LE: loop exit
PB: predicated region body
PF: predicated region fallthrough
CT: control target
= control target key end

     0   :  { %6 = vsyncpa [#allocation3], 0  ;;  %s214_s0 = inlined_call_operand.hbm [shape: f32[4,512], index: 0, kind: input, shape index: {}]   ;;  %s215_s1 = inlined_call_operand.hbm [shape: f32[4,512], index: 1, kind: output, shape index: {}]  }
   0x1   :  { %7 = vsyncpa [#allocation4], 0  ;;  %s13_s8 = sshll.u32 %s214_s0, 4  ;;  %s186_s9 = smov [#allocation2]   ;;  %s14_s8 = int_to_ptr.hbm [resolvable:$true] %s13_s8 }
   0x2   :  { %s15_s10 = sshll.u32 %s186_s9, 4  ;;  %s16_s10 = int_to_ptr.vmem [resolvable:$true] %s15_s10 }
   0x3   :  { %18 = dma.hbm_to_vmem [thread:$0]  %s14_s8, 256, %s16_s10, [#allocation3]  }
   0x4   :  { %182 = dma.done.wait [#allocation3], 256  }
   0x5   :  { %183 = vsyncadd [#allocation3], 4294967040  ;;  %v23_v0 = vld [vmem:[#allocation2] sm:$0xff]  ;;  %v24_v1 = vld [vmem:[#allocation2 + $0x8] sm:$0xff]  ;;  %vm38_vm0 = vcmask 1043456   ;;  %v187_v13 = vmov 512.0  }
   0x6   :  { %27 = vst [vmem:[#allocation1] ss:$2 sm:$0xff] %v23_v0  ;;  %130 = vrcp.f32 %v187_v13  ;;  %v188_v19 = vmov 839922192   ;;  %s189_s0 = smov [#allocation5]   ;;  %s116_s14 = sshll.u32 %s215_s1, 4  ;;  %s117_s14 = int_to_ptr.hbm [resolvable:$true] %s116_s14 }
   0x7   :  { %29 = vst [vmem:[#allocation1 + $0x10] ss:$2 sm:$0xff] %v24_v1  ;;  %v58_v20 = vunpack.c.l.s4 %v188_v19  ;;  %s114_s11 = sshll.u32 %s189_s0, 4  ;;  %s115_s11 = int_to_ptr.vmem [resolvable:$true] %s114_s11 }
   0x9   :  { %v59_v22 = vunpack.c.0.s8 %v58_v20 }
   0xc   :  { %v131_v14 = vpop.eup %130 }
   0xd   :  { %v30_v2 = vld.sshfl [vmem:[#allocation1] sm:$0xff pattern:$0x75316420]  ;;  %v31_v3 = vld.sshfl [vmem:[#allocation1 + $0x8] sm:$0xff pattern:$0x75316420]  ;;  %vm53_vm1 = vweird.f32 %v131_v14 }
   0xe   :  { %v32_v4 = vld.sshfl [vmem:[#allocation1 + $0x10] sm:$0xff pattern:$0x75316420]  ;;  %v33_v5 = vld.sshfl [vmem:[#allocation1 + $0x18] sm:$0xff pattern:$0x75316420] }
   0xf   :  { %v39_v6 = vsel %vm38_vm0, %v30_v2, 0.0  ;;  %v40_v7 = vsel %vm38_vm0, %v31_v3, 0.0  ;;  %v42_v8 = vsel %vm38_vm0, %v32_v4, 0.0  ;;  %v44_v10 = vsel %vm38_vm0, %v33_v5, 0.0 }
  0x10   :  { %v41_v9 = vadd.f32 %v40_v7, %v39_v6  ;;  %v49_v15 = vmul.f32 512.0, %v131_v14 }
  0x12   :  { %v43_v11 = vadd.f32 %v42_v8, %v41_v9  ;;  %v50_v16 = vsub.f32 1.0, %v49_v15 }
  0x14   :  { %v45_v12 = vadd.f32 %v44_v10, %v43_v11  ;;  %v51_v17 = vmul.f32 %v131_v14, %v50_v16 }
  0x16   :  { %46 = vadd.xlane.f32.xlu0 %v45_v12  ;;  %v52_v18 = vadd.f32 %v131_v14, %v51_v17 }
  0x18   :  { %v54_v21 = vsel %vm53_vm1, %v131_v14, %v52_v18 }
  0x89   :  { %v47_v23 = vpop.xlane.xlu0 %46 }
  0x8a   :  { %v55_v24 = vmul.f32 %v54_v21, %v47_v23 }
  0x8c   :  { %v60_v25 = vperm.slane %v55_v24, %v59_v22 }
  0x8e   :  { %v62_v26 = vsub.f32 %v23_v0, %v60_v25  ;;  %v63_v27 = vsub.f32 %v24_v1, %v60_v25 }
  0x90   :  { %v64_v28 = vmul.f32 %v62_v26, %v62_v26  ;;  %v65_v29 = vmul.f32 %v63_v27, %v63_v27 }
  0x92   :  { %68 = vst [vmem:[#allocation1] ss:$2 sm:$0xff] %v64_v28 }
  0x93   :  { %70 = vst [vmem:[#allocation1 + $0x10] ss:$2 sm:$0xff] %v65_v29 }
  0x99   :  { %v71_v30 = vld.sshfl [vmem:[#allocation1] sm:$0xff pattern:$0x75316420]  ;;  %v72_v31 = vld.sshfl [vmem:[#allocation1 + $0x8] sm:$0xff pattern:$0x75316420] }
  0x9a   :  { %v73_v32 = vld.sshfl [vmem:[#allocation1 + $0x10] sm:$0xff pattern:$0x75316420]  ;;  %v79_v33 = vsel %vm38_vm0, %v71_v30, 0.0  ;;  %v80_v34 = vsel %vm38_vm0, %v72_v31, 0.0 }
  0x9b   :  { %v74_v35 = vld.sshfl [vmem:[#allocation1 + $0x18] sm:$0xff pattern:$0x75316420]  ;;  %v81_v36 = vadd.f32 %v80_v34, %v79_v33  ;;  %v82_v37 = vsel %vm38_vm0, %v73_v32, 0.0 }
  0x9c   :  { %v84_v39 = vsel %vm38_vm0, %v74_v35, 0.0 }
  0x9d   :  { %v83_v38 = vadd.f32 %v82_v37, %v81_v36 }
  0x9f   :  { %v85_v40 = vadd.f32 %v84_v39, %v83_v38 }
  0xa1   :  { %86 = vadd.xlane.f32.xlu0 %v85_v40 }
 0x114   :  { %v87_v41 = vpop.xlane.xlu0 %86 }
 0x115   :  { %v88_v42 = vmul.f32 %v87_v41, %v54_v21 }
 0x117   :  { %132 = vrsqrt.f32 %v88_v42  ;;  %vm95_vm3 = vweird.f32 %v88_v42 }
 0x11d   :  { %v133_v43 = vpop.eup %132 }
 0x11e   :  { %v90_v44 = vmul.f32 %v133_v43, %v88_v42  ;;  %vm96_vm2 = vweird.f32 %v133_v43 }
 0x11f   :  { %vm97_vm4 = vmor %vm95_vm3, %vm96_vm2 }
 0x120   :  { %v91_v45 = vmul.f32 %v133_v43, %v90_v44 }
 0x122   :  { %v92_v46 = vmul.f32 0.5, %v91_v45 }
 0x124   :  { %v93_v47 = vsub.f32 1.5, %v92_v46 }
 0x126   :  { %v94_v48 = vmul.f32 %v133_v43, %v93_v47 }
 0x128   :  { %v98_v49 = vsel %vm97_vm4, %v133_v43, %v94_v48 }
 0x129   :  { %v103_v50 = vperm.slane %v98_v49, %v59_v22 }
 0x12b   :  { %v105_v51 = vmul.f32 %v103_v50, %v62_v26  ;;  %v106_v52 = vmul.f32 %v103_v50, %v63_v27 }
 0x12d   :  { %107 = vst [vmem:[#allocation5] sm:$0xff] %v105_v51 }
 0x12e   :  { %108 = vst [vmem:[#allocation5 + $0x8] sm:$0xff] %v106_v52 }
 0x12f   :  { %119 = dma.vmem_to_hbm [thread:$0]  %s115_s11, 256, %s117_s14, [#allocation4]  }
 0x130   :  { %184 = dma.done.wait [#allocation4], 256  }
 0x131   :  { %185 = vsyncadd [#allocation4], 4294967040 }
 0x132   :  { %124 = vsyncpa [#allocation3], 1 }
 0x133   :  { %125 = vsyncpa [#allocation4], 1 }

</bundles_post_ra>
